<compile_context>
chip_gen: v6e
topology: v6e:2x2x1
jax: 0.10.0
libtpu: 0.0.40
codegen_flags: <defaults>
</compile_context>

<pallas_src>
import functools

import jax
import jax.numpy as jnp
from jax.experimental import pallas as pl
from jax.experimental.pallas import tpu as pltpu


def conv_block_kernel(x_ref, w_ref, b_ref, o_ref, *, slope):
    """One grid step = one (image, row-tile).

    x_ref : (TH+2, (W+2)*Cin)      bf16  lane-dense padded input rows (2-row halo)
    w_ref : (3, (W+2)*Cin, W*Cout) bf16  banded im2col weights, one slab per ky
    b_ref : (1, W*Cout)            f32   lane-dense bias (bias tiled over W)
    o_ref : (TH, W*Cout)           out dtype, lane-dense output rows
    """
    th = o_ref.shape[0]
    # Three MXU matmuls, f32 accumulation.  The ky shift is a (cheap, bf16)
    # sublane slice straight off the ref -- nothing else is materialized.
    acc = jnp.dot(x_ref[pl.ds(0, th), :], w_ref[0],
                  preferred_element_type=jnp.float32)
    acc = acc + jnp.dot(x_ref[pl.ds(1, th), :], w_ref[1],
                        preferred_element_type=jnp.float32)
    acc = acc + jnp.dot(x_ref[pl.ds(2, th), :], w_ref[2],
                        preferred_element_type=jnp.float32)
    acc = acc + b_ref[...]                       # f32 bias broadcast
    acc = jnp.where(acc >= 0, acc, slope * acc)  # LeakyReLU(0.2) in f32
    o_ref[...] = acc.astype(o_ref.dtype)         # exact-size lane-dense store


def _pick_tile_h(n_imgs, H, W, Cin, Cout, out_itemsize):
    """Row-tile height: a multiple-of-8 divisor of H whose double-buffered block
    fits a per-chip VMEM budget, shrunk until the grid has >= 4 steps."""
    try:
        info = pltpu.get_tpu_info()
        vmem_bytes = int(getattr(info, "vmem_capacity_bytes", 64 << 20))
    except Exception:
        vmem_bytes = 64 << 20                    # assume the smallest part (v7x)
    budget = vmem_bytes // 4                     # headroom for buffers + scratch
    L, Nw = (W + 2) * Cin, W * Cout

    def block_bytes(th):
        return (2 * (th + 2) * L * 2             # x slab (bf16, double-buffered)
                + 2 * 3 * L * Nw * 2             # weight slabs (bf16)
                + 2 * Nw * 4                     # bias (f32)
                + 2 * th * Nw * out_itemsize)    # output slab

    cands = sorted([t for t in range(8, H + 1, 8) if H % t == 0],
                   reverse=True) or [H]
    fitting = [t for t in cands if block_bytes(t) <= budget] or [cands[-1]]
    th = fitting[0]
    for t in fitting:                            # largest tile with >= 4 grid steps
        if n_imgs * (H // t) >= 4:
            th = t
            break
    return th


@functools.partial(jax.jit, static_argnames=("slope", "out_dtype"))
def conv_block_forward(x_nchw, w_oihw, bias, *, slope=0.2, out_dtype=None):
    """Equivalent of ConvBlock(ndims=2).forward on an NCHW input."""
    N, Cin, H, W = x_nchw.shape
    Cout = w_oihw.shape[0]
    out_dtype = out_dtype or x_nchw.dtype
    out_itemsize = jnp.dtype(out_dtype).itemsize

    L = (W + 2) * Cin                            # lane-dense padded input row width
    Nw = W * Cout                                # lane-dense output row width
    TH = _pick_tile_h(N, H, W, Cin, Cout, out_itemsize)
    nTH = H // TH

    # ---- plain-JAX glue (small; fused by XLA under jit) ----
    # NCHW -> NHWC -> pad=1 -> fold (W+2, Cin) into the lane axis, bf16 for MXU.
    x_nhwc = jnp.transpose(x_nchw, (0, 2, 3, 1))
    x_pad = jnp.pad(x_nhwc, ((0, 0), (1, 1), (1, 1), (0, 0)))
    x_lane = x_pad.reshape(N, H + 2, L).astype(jnp.bfloat16)
    # Pre-cut overlapping (TH+2)-row halo slabs so the BlockSpecs stay simple,
    # non-overlapping blocks (duplicates only 2 rows per tile in HBM).
    x_tiles = jnp.stack(
        [x_lane[:, i * TH:i * TH + TH + 2, :] for i in range(nTH)], axis=1)

    # Banded weights: W_band[ky, (x+kx)*Cin+ci, x*Cout+co] = w[co, ci, ky, kx].
    wk = jnp.transpose(w_oihw, (2, 3, 1, 0)).astype(jnp.float32)  # (ky,kx,Cin,Cout)
    bands = []
    for ky in range(3):
        band = jnp.zeros((W + 2, Cin, W, Cout), jnp.float32)
        for kx in range(3):
            sel = jnp.eye(W + 2, W, k=-kx, dtype=jnp.float32)     # 1 at [x+kx, x]
            band = band + sel[:, None, :, None] * wk[ky, kx][None, :, None, :]
        bands.append(band.reshape(L, Nw))
    w_band = jnp.stack(bands, axis=0).astype(jnp.bfloat16)        # (3, L, Nw)

    b_row = jnp.tile(bias.astype(jnp.float32), W).reshape(1, Nw)  # lane-dense bias

    # Compiler hints: actual block budget + real work estimate.
    block_bytes = (2 * (TH + 2) * L * 2 + 2 * 3 * L * Nw * 2
                   + 2 * Nw * 4 + 2 * TH * Nw * out_itemsize)
    vmem_limit = int(min(max(2 * block_bytes + (8 << 20), 16 << 20), 64 << 20))
    cost = pl.CostEstimate(
        flops=2 * 3 * N * H * L * Nw,            # MXU work actually issued
        transcendentals=0,
        bytes_accessed=int(x_tiles.size * 2 + w_band.size * 2
                           + b_row.size * 4 + N * H * Nw * out_itemsize))

    kernel = functools.partial(conv_block_kernel, slope=slope)

    out_lane = pl.pallas_call(
        kernel,
        out_shape=jax.ShapeDtypeStruct((N, H, Nw), out_dtype),
        grid_spec=pltpu.PrefetchScalarGridSpec(
            num_scalar_prefetch=0,
            grid=(N, nTH),
            in_specs=[
                pl.BlockSpec((None, None, TH + 2, L), lambda n, h: (n, h, 0, 0)),
                pl.BlockSpec((3, L, Nw), lambda n, h: (0, 0, 0)),
                pl.BlockSpec((1, Nw), lambda n, h: (0, 0)),
            ],
            out_specs=pl.BlockSpec((None, TH, Nw), lambda n, h: (n, h, 0)),
        ),
        compiler_params=pltpu.CompilerParams(
            dimension_semantics=("parallel", "parallel"),
            vmem_limit_bytes=vmem_limit),
        cost_estimate=cost,
    )(x_tiles, w_band, b_row)

    # Exact-size result (no lane padding to slice off); only the NCHW transpose
    # required by the PyTorch convention remains.
    out_nhwc = out_lane.reshape(N, H, W, Cout)
    return jnp.transpose(out_nhwc, (0, 3, 1, 2)).astype(out_dtype)


def reference_forward(x_nchw, w_oihw, bias, *, slope=0.2):
    out = jax.lax.conv_general_dilated(
        x_nchw, w_oihw, window_strides=(1, 1), padding=((1, 1), (1, 1)),
        dimension_numbers=("NCHW", "OIHW", "NCHW"))
    out = out + bias[None, :, None, None]
    return jnp.where(out >= 0, out, slope * out)


if __name__ == "__main__":
    key = jax.random.PRNGKey(0)
    k_x, k_w, k_b = jax.random.split(key, 3)

    N, Cin, Cout, H, W = 2, 4, 8, 16, 16

    x = jax.random.normal(k_x, (N, Cin, H, W), dtype=jnp.float32)
    # PyTorch Conv2d weight shape: (O, I, 3, 3).
    w = 0.1 * jax.random.normal(k_w, (Cout, Cin, 3, 3), dtype=jnp.float32)
    b = 0.1 * jax.random.normal(k_b, (Cout,), dtype=jnp.float32)

    out = conv_block_forward(x, w, b)
    out = jax.block_until_ready(out)

    ref = reference_forward(x, w, b)
    assert out.shape == (N, Cout, H, W)
    # bf16 MXU inputs -> loosened tolerance vs the f32 reference.
    assert jnp.allclose(out, ref, atol=3e-2, rtol=3e-2), "mismatch vs reference conv"

    print("KERNEL_OK")
</pallas_src>

<mosaic_0001>
module attributes {stable_mosaic.version = 11 : i64} {
  func.func @conv_block_kernel(%arg0: i32, %arg1: i32, %arg2: memref<1x1x10x72xbf16, #tpu.memory_space<vmem>>, %arg3: memref<3x72x128xbf16, #tpu.memory_space<vmem>>, %arg4: memref<1x128xf32, #tpu.memory_space<vmem>>, %arg5: memref<1x8x128xf32, #tpu.memory_space<vmem>>) attributes {dimension_semantics = [#tpu.dimension_semantics<parallel>, #tpu.dimension_semantics<parallel>], iteration_bounds = array<i64: 2, 2>, scalar_prefetch = 0 : i64, scratch_operands = 0 : i64, tpu.core_type = #tpu.core_type<tc>, window_params = [{transform_indices = @transform_0, window_bounds = array<i64: 1, 1, 10, 72>}, {pipeline_mode = #tpu.pipeline_mode<synchronous>, transform_indices = @transform_1, window_bounds = array<i64: 3, 72, 128>}, {pipeline_mode = #tpu.pipeline_mode<synchronous>, transform_indices = @transform_2, window_bounds = array<i64: 1, 128>}, {transform_indices = @transform_3, window_bounds = array<i64: 1, 8, 128>}]} {
    %c0 = arith.constant 0 : index
    %c0_0 = arith.constant 0 : index
    %c0_1 = arith.constant 0 : index
    %c0_2 = arith.constant 0 : index
    %0 = vector.load %arg2[%c0, %c0_0, %c0_1, %c0_2] : memref<1x1x10x72xbf16, #tpu.memory_space<vmem>>, vector<1x1x8x72xbf16>
    %1 = vector.shape_cast %0 : vector<1x1x8x72xbf16> to vector<8x72xbf16>
    %c0_3 = arith.constant 0 : index
    %c0_4 = arith.constant 0 : index
    %c0_5 = arith.constant 0 : index
    %2 = vector.load %arg3[%c0_3, %c0_4, %c0_5] : memref<3x72x128xbf16, #tpu.memory_space<vmem>>, vector<1x72x128xbf16>
    %3 = vector.shape_cast %2 : vector<1x72x128xbf16> to vector<72x128xbf16>
    %cst = arith.constant dense<0.000000e+00> : vector<8x128xf32>
    %4 = tpu.matmul %1, %3, %cst {dimension_numbers = #tpu.dot_dimension_numbers<[1], [0], [0], [1], [0, 0, 1, 1], [], []>} : vector<8x72xbf16>, vector<72x128xbf16>, vector<8x128xf32> -> vector<8x128xf32>
    %c0_6 = arith.constant 0 : index
    %c0_7 = arith.constant 0 : index
    %c1 = arith.constant 1 : index
    %c0_8 = arith.constant 0 : index
    %5 = vector.load %arg2[%c0_6, %c0_7, %c1, %c0_8] : memref<1x1x10x72xbf16, #tpu.memory_space<vmem>>, vector<1x1x8x72xbf16>
    %6 = vector.shape_cast %5 : vector<1x1x8x72xbf16> to vector<8x72xbf16>
    %c1_9 = arith.constant 1 : index
    %c0_10 = arith.constant 0 : index
    %c0_11 = arith.constant 0 : index
    %7 = vector.load %arg3[%c1_9, %c0_10, %c0_11] : memref<3x72x128xbf16, #tpu.memory_space<vmem>>, vector<1x72x128xbf16>
    %8 = vector.shape_cast %7 : vector<1x72x128xbf16> to vector<72x128xbf16>
    %cst_12 = arith.constant dense<0.000000e+00> : vector<8x128xf32>
    %9 = tpu.matmul %6, %8, %cst_12 {dimension_numbers = #tpu.dot_dimension_numbers<[1], [0], [0], [1], [0, 0, 1, 1], [], []>} : vector<8x72xbf16>, vector<72x128xbf16>, vector<8x128xf32> -> vector<8x128xf32>
    %10 = arith.addf %4, %9 : vector<8x128xf32>
    %c0_13 = arith.constant 0 : index
    %c0_14 = arith.constant 0 : index
    %c2 = arith.constant 2 : index
    %c0_15 = arith.constant 0 : index
    %11 = vector.load %arg2[%c0_13, %c0_14, %c2, %c0_15] : memref<1x1x10x72xbf16, #tpu.memory_space<vmem>>, vector<1x1x8x72xbf16>
    %12 = vector.shape_cast %11 : vector<1x1x8x72xbf16> to vector<8x72xbf16>
    %c2_16 = arith.constant 2 : index
    %c0_17 = arith.constant 0 : index
    %c0_18 = arith.constant 0 : index
    %13 = vector.load %arg3[%c2_16, %c0_17, %c0_18] : memref<3x72x128xbf16, #tpu.memory_space<vmem>>, vector<1x72x128xbf16>
    %14 = vector.shape_cast %13 : vector<1x72x128xbf16> to vector<72x128xbf16>
    %cst_19 = arith.constant dense<0.000000e+00> : vector<8x128xf32>
    %15 = tpu.matmul %12, %14, %cst_19 {dimension_numbers = #tpu.dot_dimension_numbers<[1], [0], [0], [1], [0, 0, 1, 1], [], []>} : vector<8x72xbf16>, vector<72x128xbf16>, vector<8x128xf32> -> vector<8x128xf32>
    %16 = arith.addf %10, %15 : vector<8x128xf32>
    %c0_20 = arith.constant 0 : index
    %c0_21 = arith.constant 0 : index
    %17 = vector.load %arg4[%c0_20, %c0_21] : memref<1x128xf32, #tpu.memory_space<vmem>>, vector<1x128xf32>
    %18 = vector.broadcast %17 : vector<1x128xf32> to vector<8x128xf32>
    %19 = arith.addf %16, %18 : vector<8x128xf32>
    %cst_22 = arith.constant 0.000000e+00 : f32
    %20 = vector.broadcast %cst_22 : f32 to vector<8x128xf32>
    %21 = arith.cmpf oge, %19, %20 : vector<8x128xf32>
    %cst_23 = arith.constant 2.000000e-01 : f32
    %22 = vector.broadcast %cst_23 : f32 to vector<8x128xf32>
    %23 = arith.mulf %22, %19 : vector<8x128xf32>
    %24 = arith.select %21, %19, %23 : vector<8x128xi1>, vector<8x128xf32>
    %c0_24 = arith.constant 0 : index
    %c0_25 = arith.constant 0 : index
    %c0_26 = arith.constant 0 : index
    %25 = vector.load %arg5[%c0_24, %c0_25, %c0_26] : memref<1x8x128xf32, #tpu.memory_space<vmem>>, vector<1x8x128xf32>
    %26 = vector.shape_cast %25 : vector<1x8x128xf32> to vector<8x128xf32>
    %27 = vector.shape_cast %24 : vector<8x128xf32> to vector<1x8x128xf32>
    tpu.vector_store %arg5[%c0_24, %c0_25, %c0_26], %27 {strides = array<i32>} : memref<1x8x128xf32, #tpu.memory_space<vmem>>, vector<1x8x128xf32>,
    return
  }
  func.func @transform_0(%arg0: i32, %arg1: i32) -> (i32, i32, i32, i32) {
    %c0_i32 = arith.constant 0 : i32
    %c0_i32_0 = arith.constant 0 : i32
    %c0_i32_1 = arith.constant 0 : i32
    return %arg0, %arg1, %c0_i32, %c0_i32_0 : i32, i32, i32, i32
  }
  func.func @transform_1(%arg0: i32, %arg1: i32) -> (i32, i32, i32) {
    %c0_i32 = arith.constant 0 : i32
    %c0_i32_0 = arith.constant 0 : i32
    %c0_i32_1 = arith.constant 0 : i32
    %c0_i32_2 = arith.constant 0 : i32
    return %c0_i32, %c0_i32_0, %c0_i32_1 : i32, i32, i32
  }
  func.func @transform_2(%arg0: i32, %arg1: i32) -> (i32, i32) {
    %c0_i32 = arith.constant 0 : i32
    %c0_i32_0 = arith.constant 0 : i32
    %c0_i32_1 = arith.constant 0 : i32
    return %c0_i32, %c0_i32_0 : i32, i32
  }
  func.func @transform_3(%arg0: i32, %arg1: i32) -> (i32, i32, i32) {
    %c0_i32 = arith.constant 0 : i32
    %c0_i32_0 = arith.constant 0 : i32
    return %arg0, %arg1, %c0_i32 : i32, i32, i32
  }
}

</mosaic_0001>

<bundles_post_ra>
// kernel: tile.8
= control target key start
LH: loop header
LB: loop body
LE: loop exit
PB: predicated region body
PF: predicated region fallthrough
CT: control target
= control target key end

     0   :  { %s28_s0 = inlined_call_operand.vmem [shape: f32[8], index: 0, kind: input, shape index: {}]   ;;  %s29_s1 = inlined_call_operand.vmem [shape: f32[16,8], index: 1, kind: output, shape index: {}]  }
   0x1   :  { %v4_v0 = vld [vmem:[%s28_s0] ss:$0 sm:$0xff] }
   0x2   :  { %5 = vst [vmem:[%s29_s1] sm:$0xff] %v4_v0  ;;  %8 = vst [vmem:[%s29_s1 + $0x8] sm:$0xff] %v4_v0 }

// kernel: tile.9
= control target key start
LH: loop header
LB: loop body
LE: loop exit
PB: predicated region body
PF: predicated region fallthrough
CT: control target
= control target key end

     0   :  { %s133_s10 = smov 120   ;;  %s134_s11 = smov 104   ;;  %vm3_vm0 = vcmask 64512   ;;  %vm9_vm1 = vcmask 1048512   ;;  %vm15_vm2 = vcmask 982912   ;;  %vm21_vm3 = vcmask 917312   ;;  %s209_s0 = inlined_call_operand.vmem [shape: f32[16,8], index: 0, kind: input, shape index: {}]   ;;  %s210_s1 = inlined_call_operand.vmem [shape: f32[1,128], index: 1, kind: output, shape index: {}]  }
   0x1   :  { %v103_v0 = vld [vmem:[%s209_s0 + $0xf] sm:$0x1]   ;;  %v105_v1 = vld [vmem:[%s209_s0 + $0xd] sm:$0x1]   ;;  %v104_v2 = vld [vmem:[%s209_s0 + $0xe] sm:$0x1]  }
   0x2   :  { %7 = vrot.lane.b32.xlu0 %v103_v0, %s133_s10  ;;  %19 = vrot.lane.b32.xlu1 %v105_v1, %s134_s11  ;;  %v106_v3 = vld [vmem:[%s209_s0 + $0xc] sm:$0x1]   ;;  %s135_s16 = smov 112   ;;  %s136_s17 = smov 96   ;;  %v107_v4 = vld [vmem:[%s209_s0 + $0xb] sm:$0x1]  }
   0x3   :  { %v108_v5 = vld [vmem:[%s209_s0 + $0xa] sm:$0x1]   ;;  %v2_v6 = vld [vmem:[%s209_s0] sm:$0x1]   ;;  %s137_s24 = smov 88   ;;  %s138_s25 = smov 80  }
   0x4   :  { %4 = vst.msk [vmem:[#allocation0] sm:$0x1] %vm3_vm0, %v2_v6   ;;  %v109_v7 = vld [vmem:[%s209_s0 + $0x9] sm:$0x1]   ;;  %v110_v8 = vld [vmem:[%s209_s0 + $0x8] sm:$0x1]  }
   0x5   :  { %s139_s30 = smov 72   ;;  %s140_s2 = smov 64   ;;  %v111_v9 = vld [vmem:[%s209_s0 + $0x7] sm:$0x1]   ;;  %v112_v10 = vld [vmem:[%s209_s0 + $0x6] sm:$0x1]  }
   0x6   :  { %13 = vrot.lane.b32.xlu0 %v104_v2, %s135_s16  ;;  %25 = vrot.lane.b32.xlu1 %v106_v3, %s136_s17  ;;  %s141_s7 = smov 56   ;;  %s142_s8 = smov 48   ;;  %v113_v11 = vld [vmem:[%s209_s0 + $0x5] sm:$0x1]   ;;  %v114_v12 = vld [vmem:[%s209_s0 + $0x4] sm:$0x1]  }
   0x7   :  { %s143_s13 = smov 40   ;;  %s144_s14 = smov 32   ;;  %v115_v13 = vld [vmem:[%s209_s0 + $0x3] sm:$0x1]   ;;  %v116_v14 = vld [vmem:[%s209_s0 + $0x2] sm:$0x1]  }
   0x8   :  { %s145_s19 = smov 24   ;;  %s146_s20 = smov 16   ;;  %v117_v15 = vld [vmem:[%s209_s0 + $0x1] sm:$0x1]   ;;  %vm27_vm4 = vcmask 851712   ;;  %vm33_vm5 = vcmask 786112  }
   0x9   :  { %s147_s0 = smov 8   ;;  %vm39_vm6 = vcmask 720512   ;;  %vm45_vm7 = vcmask 654912   ;;  %vm51_vm8 = vcmask 589312   ;;  %vm57_vm9 = vcmask 523712  }
   0xa   :  { %31 = vrot.lane.b32.xlu0 %v107_v4, %s137_s24  ;;  %37 = vrot.lane.b32.xlu1 %v108_v5, %s138_s25  ;;  %vm63_vm10 = vcmask 458112   ;;  %vm69_vm11 = vcmask 392512   ;;  %vm75_vm12 = vcmask 326912   ;;  %vm81_vm13 = vcmask 261312  }
   0xb   :  { %vm87_vm14 = vcmask 195712   ;;  %vm93_vm15 = vcmask 130112  }
   0xe   :  { %43 = vrot.lane.b32.xlu0 %v109_v7, %s139_s30  ;;  %49 = vrot.lane.b32.xlu1 %v110_v8, %s140_s2 }
  0x12   :  { %55 = vrot.lane.b32.xlu0 %v111_v9, %s141_s7  ;;  %61 = vrot.lane.b32.xlu1 %v112_v10, %s142_s8 }
  0x16   :  { %67 = vrot.lane.b32.xlu0 %v113_v11, %s143_s13  ;;  %73 = vrot.lane.b32.xlu1 %v114_v12, %s144_s14 }
  0x1a   :  { %79 = vrot.lane.b32.xlu0 %v115_v13, %s145_s19  ;;  %85 = vrot.lane.b32.xlu1 %v116_v14, %s146_s20 }
  0x1e   :  { %91 = vrot.lane.b32.xlu0 %v117_v15, %s147_s0 }
  0x74   :  { %v8_v16 = vpop.permute.xlu0 %7   ;;  %v20_v17 = vpop.permute.xlu1 %19  }
  0x75   :  { %10 = vst.msk [vmem:[#allocation0] sm:$0x1] %vm9_vm1, %v8_v16  }
  0x78   :  { %v14_v18 = vpop.permute.xlu0 %13   ;;  %v26_v19 = vpop.permute.xlu1 %25  }
  0x79   :  { %16 = vst.msk [vmem:[#allocation0] sm:$0x1] %vm15_vm2, %v14_v18  }
  0x7a   :  { %22 = vst.msk [vmem:[#allocation0] sm:$0x1] %vm21_vm3, %v20_v17  }
  0x7b   :  { %28 = vst.msk [vmem:[#allocation0] sm:$0x1] %vm27_vm4, %v26_v19  }
  0x7c   :  { %v32_v20 = vpop.permute.xlu0 %31   ;;  %v38_v21 = vpop.permute.xlu1 %37  }
  0x7d   :  { %34 = vst.msk [vmem:[#allocation0] sm:$0x1] %vm33_vm5, %v32_v20  }
  0x7e   :  { %40 = vst.msk [vmem:[#allocation0] sm:$0x1] %vm39_vm6, %v38_v21  }
  0x80   :  { %v44_v22 = vpop.permute.xlu0 %43   ;;  %v50_v23 = vpop.permute.xlu1 %49  }
  0x81   :  { %46 = vst.msk [vmem:[#allocation0] sm:$0x1] %vm45_vm7, %v44_v22  }
  0x82   :  { %52 = vst.msk [vmem:[#allocation0] sm:$0x1] %vm51_vm8, %v50_v23  }
  0x84   :  { %v56_v24 = vpop.permute.xlu0 %55   ;;  %v62_v25 = vpop.permute.xlu1 %61  }
  0x85   :  { %58 = vst.msk [vmem:[#allocation0] sm:$0x1] %vm57_vm9, %v56_v24  }
  0x86   :  { %64 = vst.msk [vmem:[#allocation0] sm:$0x1] %vm63_vm10, %v62_v25  }
  0x88   :  { %v68_v26 = vpop.permute.xlu0 %67   ;;  %v74_v27 = vpop.permute.xlu1 %73  }
  0x89   :  { %70 = vst.msk [vmem:[#allocation0] sm:$0x1] %vm69_vm11, %v68_v26  }
  0x8a   :  { %76 = vst.msk [vmem:[#allocation0] sm:$0x1] %vm75_vm12, %v74_v27  }
  0x8c   :  { %v80_v28 = vpop.permute.xlu0 %79   ;;  %v86_v29 = vpop.permute.xlu1 %85  }
  0x8d   :  { %82 = vst.msk [vmem:[#allocation0] sm:$0x1] %vm81_vm13, %v80_v28  }
  0x8e   :  { %88 = vst.msk [vmem:[#allocation0] sm:$0x1] %vm87_vm14, %v86_v29  }
  0x90   :  { %v92_v30 = vpop.permute.xlu0 %91  }
  0x91   :  { %94 = vst.msk [vmem:[#allocation0] sm:$0x1] %vm93_vm15, %v92_v30  }
  0x98   :  { %v99_v31 = vld [vmem:[#allocation0] sm:$0x1] }
  0x99   :  { %102 = vst [vmem:[%s210_s1] sm:$0x1] %v99_v31 }

// kernel: conv_block_forward.1
= control target key start
LH: loop header
LB: loop body
LE: loop exit
PB: predicated region body
PF: predicated region fallthrough
CT: control target
= control target key end

     0   :  { %s809_s12 = smov 0   ;;  %s811_s13 = smov 0   ;;  %s956_s0 = inlined_call_operand.vmem [shape: bf16[2,2,10,72], index: 0, kind: input, shape index: {}]   ;;  %s957_s1 = inlined_call_operand.vmem [shape: bf16[3,72,128], index: 1, kind: input, shape index: {}]   ;;  %s958_s2 = inlined_call_operand.vmem [shape: f32[1,128], index: 2, kind: input, shape index: {}]   ;;  %s959_s3 = inlined_call_operand.vmem [shape: f32[2,16,128], index: 3, kind: output, shape index: {}]  }
   0x1   :  { %s813_s14 = smov 0   ;;  %s815_s15 = smov 0  }
   0x2   :  { %s817_s16 = smov 0  }
   0x3 LB: > { %s22_s17 = sadd.s32 1, %s777_s14  ;;  %s25_s18 = sadd.s32 1, %s781_s15  ;;  %s785_s16 = sphi %s817_s16, %s13_s16   ;;  %s781_s15 = sphi %s815_s15, %s963_s15   ;;  %s777_s14 = sphi %s813_s14, %s962_s14   ;;  %s773_s13 = sphi %s811_s13, %s961_s13   ;;  %s769_s12 = sphi %s809_s12, %s960_s12  }
   0x4   : > { %p23_p0 = scmp.ge.s32.totalorder %s22_s17, 2  ;;  %p581_p1 = scmp.ge.s32.totalorder %s785_s16, 1 }
   0x5   : > { %p157_p2 = scmp.lt.s32.totalorder %s785_s16, 5 }
   0x6   : > { %s965_s17 = smov (%p23_p0, %s22_s17), 0  ;;  %s967_s18 = smov (!%p23_p0, %s25_s18), %s781_s15 }
   0x7   : > { %p158_p3 = pnand %p581_p1, %p157_p2  ;;  %p27_p4 = scmp.ge.s32.totalorder %s967_s18, 2 }
   0x8   : > { %p188_p5 = scmp.lt.s32.totalorder (!%p158_p3), %s773_s13, 1  ;;  %p190_p6 = scmp.lt.s32.totalorder (!%p158_p3), %s769_s12, 1 }
   0x9   : > { %s969_s18 = smov (%p27_p4, %s967_s18), 0  ;;  %161 = sbr.rel (%p158_p3) target bundleno = 256 (0x100), region = 32 }
   0xe   : > { %v730_v0 = vld [vmem:[%s957_s1 + $0x44] ss:$0 sps:$4 sm:$0xff]   ;;  %vm270_vm0 = vcmask 1043456   ;;  %v787_v1 = vmov 0.0   ;;  %v731_v2 = vld [vmem:[%s957_s1 + $0x20] ss:$0 sps:$4 sm:$0xff]  }
   0xf   : > { %646 = vmatprep.subr.bf16.mxu0 %v787_v1  ;;  %660 = vmatprep.subr.bf16.mxu1 %v787_v1  ;;  %v272_v3 = vsel %vm270_vm0, %v730_v0, 0  ;;  %v345_v4 = vsel %vm270_vm0, %v731_v2, 0  ;;  %v732_v5 = vld [vmem:[%s957_s1 + $0x3c] sm:$0xff]   ;;  %vm788_vm1 = vmmov 0   ;;  %v734_v7 = vld [vmem:[%s957_s1 + $0x34] sm:$0xff]   ;;  %s971_s13 = smov (!%p188_p5, %s773_s13), 1 }
  0x10   : > { %647 = vmatpush3.bf16.msra.mxu0 %v272_v3  ;;  %661 = vmatpush3.bf16.msra.mxu1 %v345_v4  ;;  %v733_v6 = vld [vmem:[%s957_s1 + $0x18] sm:$0xff]   ;;  %v735_v8 = vld [vmem:[%s957_s1 + $0x10] sm:$0xff]   ;;  %s973_s12 = smov (!%p190_p6, %s769_s12), 1  ;;  %s583_s4 = sshll.u32 %s971_s13, 2  ;;  %v737_v10 = vld [vmem:[%s957_s1 + $0x8] sm:$0xff]   ;;  %vm266_vm2 = vcmask 588800  }
  0x11   : > { %648 = vmatprep.subr.bf16.mxu0 %v787_v1  ;;  %662 = vmatprep.subr.bf16.mxu1 %v787_v1  ;;  %v736_v9 = vld [vmem:[%s957_s1 + $0x2c] sm:$0xff]   ;;  %s582_s7 = sshll.u32 %s973_s12, 1  ;;  %v738_v13 = vld [vmem:[%s957_s1 + $0x24] sm:$0xff]   ;;  %v743_v23 = vld [vmem:[%s957_s1 + $0x58] sm:$0xff]   ;;  %s585_s9 = sshll.u32 %s971_s13, 1 }
  0x12   : > { %656 = vmatprep.mubr.msk.bf16.mxu0 %vm788_vm1, %v787_v1  ;;  %670 = vmatprep.mubr.msk.bf16.mxu1 %vm788_vm1, %v787_v1  ;;  %s194_s8 = sadd.s32 %s583_s4, %s582_s7  ;;  %v739_v15 = vld [vmem:[%s957_s1] sm:$0xff]   ;;  %v741_v18 = vld [vmem:[%s957_s1 + $0x68] ss:$0 sps:$4 sm:$0xff]   ;;  %v744_v24 = vld [vmem:[%s957_s1 + $0x50] sm:$0xff]   ;;  %s202_s10 = sadd.s32 %s585_s9, %s973_s12 }
  0x13   : > { %s584_s11 = sshll.u32 %s194_s8, 2  ;;  %v433_v21 = vsel %vm270_vm0, %v741_v18, 0  ;;  %v742_v22 = vld [vmem:[%s957_s1 + $0x60] sm:$0xff]   ;;  %v745_v27 = vld [vmem:[%s957_s1 + $0x48] sm:$0xff]   ;;  %s586_s20 = sshll.u32 %s202_s10, 3 }
  0x14   : > { %649 = vmatpush3.bf16.msra.mxu0 %v732_v5  ;;  %663 = vmatpush3.bf16.msra.mxu1 %v733_v6  ;;  %s894_s21 = scalar_lea.vmem %s956_s0, %s584_s11  ;;  %v625_v39 = vld [vmem:[%s958_s2] ss:$0 sm:$0xff]  ;;  %s204_s23 = scalar_lea.vmem %s959_s3, %s586_s20 }
  0x15   : > { %650 = vmatprep.subr.bf16.mxu0 %v787_v1  ;;  %664 = vmatprep.subr.bf16.mxu1 %v787_v1  ;;  %v206_v11 = vld [vmem:[%s894_s21] sm:$0xf]  ;;  %v216_v12 = vld [vmem:[%s894_s21 + $0x4] sm:$0x1] }
  0x16   : > { %v596_v14 = vcombine.low %v206_v11, %v216_v12  ;;  %v387_v25 = vld [vmem:[%s894_s21] sm:$0xe] }
  0x17   : > { %v618_v26 = vcombine.low %v387_v25, %v216_v12 }
  0x18   : > { %651 = vmatpush3.bf16.msra.mxu0 %v734_v7  ;;  %665 = vmatpush3.bf16.msra.mxu1 %v735_v8  ;;  %v233_v16 = vshrl.u32 %v596_v14, 16  ;;  %v235_v17 = vshll.u32 %v596_v14, 16 }
  0x19   : > { %652 = vmatprep.subr.bf16.mxu0 %v787_v1  ;;  %666 = vmatprep.subr.bf16.mxu1 %v787_v1  ;;  %v401_v28 = vrot.slane %v618_v26, 1 }
  0x1a   : > { %v237_v19 = vrot.slane %v235_v17, 1 }
  0x1c   : > { %653 = vmatpush3.bf16.msra.mxu0 %v736_v9  ;;  %667 = vmatpush3.bf16.msra.mxu1 %v737_v10  ;;  %v238_v20 = vor.u32 %v237_v19, %v233_v16 }
  0x1d   : > { %654 = vmatprep.subr.bf16.mxu0 %v787_v1  ;;  %668 = vmatprep.subr.bf16.mxu1 %v787_v1 }
  0x20   : > { %655 = vmatpush3.bf16.msra.mxu0 %v738_v13  ;;  %669 = vmatpush3.bf16.msra.mxu1 %v739_v15 }
  0x21   : > { %674 = vmatprep.subr.bf16.mxu0 %v787_v1 }
  0x23   : > { %657 = vmatmul.mubr.msk.bf16.vlgmr.msra.gmra.mxu0 %vm266_vm2, %v238_v20  ;;  %671 = vmatmul.mubr.msk.bf16.vlgmr.msra.gmra.mxu1 %vm266_vm2, %v206_v11 }
  0x24   : > { %675 = vmatpush3.bf16.msra.mxu0 %v433_v21  ;;  %684 = vmatprep.mubr.msk.bf16.mxu0 %vm788_vm1, %v787_v1 }
  0x25   : > { %676 = vmatprep.subr.bf16.mxu0 %v787_v1 }
  0x28   : > { %677 = vmatpush3.bf16.msra.mxu0 %v742_v22 }
  0x29   : > { %678 = vmatprep.subr.bf16.mxu0 %v787_v1 }
  0x2c   : > { %679 = vmatpush3.bf16.msra.mxu0 %v743_v23 }
  0x2d   : > { %680 = vmatprep.subr.bf16.mxu0 %v787_v1 }
  0x30   : > { %681 = vmatpush3.bf16.msra.mxu0 %v744_v24 }
  0x31   : > { %682 = vmatprep.subr.bf16.mxu0 %v787_v1 }
  0x34   : > { %683 = vmatpush3.bf16.msra.mxu0 %v745_v27 }
  0x37   : > { %685 = vmatmul.mubr.msk.bf16.vlgmr.msra.gmra.mxu0 %vm266_vm2, %v401_v28 }
  0xe3   : > { %v308_v29 = vpop.f32.mrf.mxu0  ;;  %v381_v30 = vpop.f32.mrf.mxu1 }
  0xe4   : > { %v382_v37 = vadd.f32 %v381_v30, %v308_v29 }
  0xe5   : > { %v658_v31 = vpop.f32.mrf.mxu0  ;;  %v672_v32 = vpop.f32.mrf.mxu1 }
  0xe7   : > { %v311_v33 = vpop.f32.mrf.mxu0  ;;  %v384_v34 = vpop.f32.mrf.mxu1 }
  0xe9   : > { %v659_v35 = vpop.f32.mrf.mxu0  ;;  %v673_v36 = vpop.f32.mrf.mxu1 }
  0xf7   : > { %v469_v38 = vpop.f32.mrf.mxu0 }
  0xf8   : > { %v475_v40 = vadd.f32 %v469_v38, %v382_v37 }
  0xf9   : > { %v686_v41 = vpop.f32.mrf.mxu0 }
  0xfa   : > { %v483_v42 = vadd.f32 %v625_v39, %v475_v40 }
  0xfb   : > { %v472_v43 = vpop.f32.mrf.mxu0 }
  0xfc   : > { %vm484_vm3 = vcmp.ge.f32.partialorder %v483_v42, 0.0  ;;  %v485_v44 = vmul.f32 0.2, %v483_v42 }
  0xfd   : > { %v687_v45 = vpop.f32.mrf.mxu0 }
  0xfe   : > { %v486_v46 = vsel %vm484_vm3, %v483_v42, %v485_v44 }
  0xff   : > { %487 = vst [vmem:[%s204_s23] sm:$0xff] %v486_v46 }
 0x100 PF: > { %s13_s16 = sadd.s32 1, %s785_s16   ;;  %s960_s12 = smov %s777_s14 }
 0x101   : > { %p10_p7 = scmp.ge.s32.totalorder %s13_s16, 6   ;;  %s961_s13 = smov %s781_s15 }
 0x102   : > { %s962_s14 = smov %s965_s17  ;;  %s963_s15 = smov %s969_s18 }
 0x103   :  { %12 = sbr.rel (!%p10_p7) target bundleno = 3 (0x3), region = 64 }

</bundles_post_ra>
